<compile_context>
chip_gen: v6e
topology: v6e:2x2x1
jax: 0.10.0
libtpu: 0.0.40
codegen_flags: <defaults>
</compile_context>

<pallas_src>
import math

import jax
import jax.numpy as jnp
from jax.experimental import pallas as pl
from jax.experimental.pallas import tpu as pltpu

N_EMBD = 32           # embedding dim (small synthetic size)
HIDDEN = 4 * N_EMBD   # 128

_GELU_C = math.sqrt(2.0 / math.pi)


def ffn_kernel(x_ref, wfc_ref, bfc_ref, wproj_ref, bproj_ref, o_ref):
    """One row tile: x @ W_fc + b_fc -> tanh-GELU -> @ W_proj + b_proj."""
    mm_dtype = wfc_ref.dtype                                 # bf16 fast path or f32

    # c_fc: MXU matmul with f32 accumulation; operands in the (pre-cast) weight dtype.
    x = x_ref[...].astype(mm_dtype)                          # (tm, Dp)
    h = jnp.dot(x, wfc_ref[...], preferred_element_type=jnp.float32)
    h = h + bfc_ref[...]                                     # (tm, Hp), f32

    # GELU(approximate='tanh'), f32 math, h*h reused once (fewer VALU ops):
    #   0.5 * h * (1 + tanh( sqrt(2/pi) * (h + 0.044715 * h^3) ))
    h2 = h * h
    g = 0.5 * h * (1.0 + jnp.tanh(_GELU_C * (h + 0.044715 * h2 * h)))

    # c_proj: activation cast to the weight dtype, f32 accumulation.
    out = jnp.dot(g.astype(mm_dtype), wproj_ref[...],
                  preferred_element_type=jnp.float32)
    out = out + bproj_ref[...]                                # (tm, Dp), f32

    o_ref[...] = out.astype(o_ref.dtype)


def _round_up(a, b):
    return ((a + b - 1) // b) * b


def feed_forward(x, w_fc, b_fc, w_proj, b_proj, *,
                 block_rows=8192, matmul_dtype=jnp.bfloat16):
    """x: (..., N_EMBD) -> (..., N_EMBD).  Weights stored as (in, out).

    matmul_dtype: dtype of the MXU operands (accumulation is always f32).
                  Use jnp.float32 for bit-faithful f32 numerics, None for x.dtype.
                  (Activations may also be carried in bf16 end-to-end by passing a
                  bf16 x; the kernel and tiling handle it unchanged.)
    """
    orig_shape = x.shape
    D = orig_shape[-1]
    H = w_fc.shape[1]
    M = math.prod(orig_shape[:-1])
    x2 = x.reshape(M, D)

    mm_dtype = x2.dtype if matmul_dtype is None else jnp.dtype(matmul_dtype)

    # Lane packing factor: fold `p` consecutive rows into one 128-lane row.
    # Only worthwhile when D < 128 (lane-starved); p=1 otherwise (no kron waste).
    p = 128 // D if (D < 128 and 128 % D == 0) else 1
    Dp, Hp = p * D, p * H

    # Block-diagonal weights / tiled biases (built once in the wrapper; tiny).
    w_fc_bd = jnp.kron(jnp.eye(p, dtype=w_fc.dtype), w_fc).astype(mm_dtype)     # (Dp, Hp)
    w_proj_bd = jnp.kron(jnp.eye(p, dtype=w_proj.dtype), w_proj).astype(mm_dtype)  # (Hp, Dp)
    b_fc_t = jnp.tile(b_fc.astype(jnp.float32), p).reshape(1, Hp)
    b_proj_t = jnp.tile(b_proj.astype(jnp.float32), p).reshape(1, Dp)

    # Sublane alignment for the row-tile block shape (8 for 4-byte, 16 for 2-byte x).
    row_align = 8 if x2.dtype.itemsize == 4 else 16

    # Pad ONLY to a multiple of p (so the (M, D) -> (mp, Dp) reshape is a free,
    # contiguous reshape), plus up to `row_align` packed rows for tiny inputs.
    # No pad to a multiple of the row tile -- the ragged last grid block is masked.
    mp = -(-M // p)                                   # ceil(M / p) packed rows
    mp = max(mp, row_align)
    m_packed = mp * p
    if m_packed != M:
        x2 = jnp.pad(x2, ((0, m_packed - M), (0, 0)))
    xp = x2.reshape(mp, Dp)                           # free (contiguous) reshape

    # Row tile (in packed rows): as large as block_rows allows, clamped to the data.
    tm_p = max(row_align, min(max(block_rows // p, row_align), _round_up(mp, row_align)))
    tm_p = _round_up(tm_p, row_align)
    n_tiles = pl.cdiv(mp, tm_p)
    # v7x megacore: keep >= 2 grid steps on the "parallel" row axis when there is
    # enough work, so both TensorCores stay busy (no-op for tiny inputs).
    if n_tiles == 1 and mp > row_align:
        tm_p = max(row_align, _round_up(-(-mp // 2), row_align))
        n_tiles = pl.cdiv(mp, tm_p)

    # Scoped-VMEM budget: double-buffered in/out tiles + resident weights/biases
    # (double-buffered by default) + the f32 h/g intermediates.  Clamp to 64 MiB
    # (v7x physical ceiling); floor at 32 MiB so v5e's 16 MiB default never binds.
    x_bytes = xp.dtype.itemsize
    w_bytes = jnp.dtype(mm_dtype).itemsize
    vmem_needed = (
        2 * tm_p * Dp * x_bytes                    # input tile, double-buffered
        + 2 * tm_p * Dp * x_bytes                  # output tile, double-buffered
        + 2 * (Dp * Hp + Hp * Dp) * w_bytes        # block-diag weights
        + 2 * (Hp + Dp) * 4                        # biases
        + 2 * tm_p * Hp * 4                        # f32 h and g intermediates
    )
    vmem_limit = min(64 * 1024 * 1024, max(32 * 1024 * 1024, int(vmem_needed * 1.5)))

    out_p = pl.pallas_call(
        ffn_kernel,
        out_shape=jax.ShapeDtypeStruct((mp, Dp), x.dtype),
        grid_spec=pltpu.PrefetchScalarGridSpec(
            num_scalar_prefetch=0,
            grid=(n_tiles,),
            in_specs=[
                pl.BlockSpec((tm_p, Dp), lambda i: (i, 0)),   # packed activation rows
                pl.BlockSpec((Dp, Hp), lambda i: (0, 0)),     # block-diag W_fc (resident)
                pl.BlockSpec((1, Hp), lambda i: (0, 0)),      # tiled b_fc
                pl.BlockSpec((Hp, Dp), lambda i: (0, 0)),     # block-diag W_proj (resident)
                pl.BlockSpec((1, Dp), lambda i: (0, 0)),      # tiled b_proj
            ],
            out_specs=pl.BlockSpec((tm_p, Dp), lambda i: (i, 0)),
        ),
        compiler_params=pltpu.CompilerParams(
            dimension_semantics=("parallel",),
            vmem_limit_bytes=vmem_limit,
        ),
    )(xp, w_fc_bd, b_fc_t, w_proj_bd, b_proj_t)

    if m_packed == M:
        out = out_p.reshape(M, D)                 # free reshape, no extra HBM pass
    else:
        out = out_p.reshape(m_packed, D)[:M]      # only when M % p != 0 (tiny pad)
    return out.reshape(orig_shape)


def _reference(x, w_fc, b_fc, w_proj, b_proj):
    """Pure-JAX f32 reference for correctness checking."""
    h = jnp.einsum("...d,dh->...h", x.astype(jnp.float32),
                   w_fc.astype(jnp.float32)) + b_fc
    g = 0.5 * h * (1.0 + jnp.tanh(_GELU_C * (h + 0.044715 * h ** 3)))
    return jnp.einsum("...h,hd->...d", g, w_proj.astype(jnp.float32)) + b_proj


if __name__ == "__main__":
    key = jax.random.PRNGKey(0)
    k_x, k_wfc, k_bfc, k_wp, k_bp = jax.random.split(key, 5)

    # Deterministic parameter init (PyTorch nn.Linear-style uniform bounds).
    bound_fc = 1.0 / math.sqrt(N_EMBD)
    bound_proj = 1.0 / math.sqrt(HIDDEN)
    w_fc = jax.random.uniform(k_wfc, (N_EMBD, HIDDEN), jnp.float32,
                              -bound_fc, bound_fc)
    b_fc = jax.random.uniform(k_bfc, (HIDDEN,), jnp.float32,
                              -bound_fc, bound_fc)
    w_proj = jax.random.uniform(k_wp, (HIDDEN, N_EMBD), jnp.float32,
                                -bound_proj, bound_proj)
    b_proj = jax.random.uniform(k_bp, (N_EMBD,), jnp.float32,
                                -bound_proj, bound_proj)

    # Main check: small nanoGPT-style shape (B, T, N_EMBD).
    B, T = 2, 8
    x = jax.random.normal(k_x, (B, T, N_EMBD), dtype=jnp.float32)
    ref = _reference(x, w_fc, b_fc, w_proj, b_proj)

    # Exact path (f32 MXU operands): tight tolerance.
    out_f32 = jax.block_until_ready(
        feed_forward(x, w_fc, b_fc, w_proj, b_proj, matmul_dtype=jnp.float32))
    assert out_f32.shape == (B, T, N_EMBD)
    assert jnp.allclose(out_f32, ref, atol=1e-4, rtol=1e-4)

    # Default fast path (bf16 MXU operands, f32 accumulation + f32 GELU).
    out_bf = jax.block_until_ready(feed_forward(x, w_fc, b_fc, w_proj, b_proj))
    assert out_bf.shape == (B, T, N_EMBD)
    assert jnp.allclose(out_bf, ref, atol=2e-2, rtol=2e-2)

    # Row count not divisible by the lane-pack factor (exercises the small pad + slice).
    x2 = jax.random.normal(k_x, (3, 5, N_EMBD), dtype=jnp.float32)
    out2 = jax.block_until_ready(feed_forward(x2, w_fc, b_fc, w_proj, b_proj))
    ref2 = _reference(x2, w_fc, b_fc, w_proj, b_proj)
    assert out2.shape == (3, 5, N_EMBD)
    assert jnp.allclose(out2, ref2, atol=2e-2, rtol=2e-2)

    # Multi-step grid with a ragged (masked) last block and no wrapper pad/slice
    # (M = 2000 is divisible by p = 4).  Also exercises the >=2-step megacore split.
    x3 = jax.random.normal(k_x, (4, 500, N_EMBD), dtype=jnp.float32)
    out3 = jax.block_until_ready(feed_forward(x3, w_fc, b_fc, w_proj, b_proj))
    ref3 = _reference(x3, w_fc, b_fc, w_proj, b_proj)
    assert out3.shape == (4, 500, N_EMBD)
    assert jnp.allclose(out3, ref3, atol=2e-2, rtol=2e-2)

    print("KERNEL_OK")
</pallas_src>

<mosaic_0001>
module attributes {stable_mosaic.version = 11 : i64} {
  func.func @ffn_kernel(%arg0: i32, %arg1: memref<8x128xf32, #tpu.memory_space<vmem>>, %arg2: memref<128x512xf32, #tpu.memory_space<vmem>>, %arg3: memref<1x512xf32, #tpu.memory_space<vmem>>, %arg4: memref<512x128xf32, #tpu.memory_space<vmem>>, %arg5: memref<1x128xf32, #tpu.memory_space<vmem>>, %arg6: memref<8x128xf32, #tpu.memory_space<vmem>>) attributes {dimension_semantics = [#tpu.dimension_semantics<parallel>], iteration_bounds = array<i64: 1>, scalar_prefetch = 0 : i64, scratch_operands = 0 : i64, tpu.core_type = #tpu.core_type<tc>, window_params = [{transform_indices = @transform_0, window_bounds = array<i64: 8, 128>}, {pipeline_mode = #tpu.pipeline_mode<synchronous>, transform_indices = @transform_1, window_bounds = array<i64: 128, 512>}, {pipeline_mode = #tpu.pipeline_mode<synchronous>, transform_indices = @transform_2, window_bounds = array<i64: 1, 512>}, {pipeline_mode = #tpu.pipeline_mode<synchronous>, transform_indices = @transform_3, window_bounds = array<i64: 512, 128>}, {pipeline_mode = #tpu.pipeline_mode<synchronous>, transform_indices = @transform_4, window_bounds = array<i64: 1, 128>}, {transform_indices = @transform_5, window_bounds = array<i64: 8, 128>}]} {
    %c0 = arith.constant 0 : index
    %c0_0 = arith.constant 0 : index
    %0 = vector.load %arg1[%c0, %c0_0] : memref<8x128xf32, #tpu.memory_space<vmem>>, vector<8x128xf32>
    %c0_1 = arith.constant 0 : index
    %c0_2 = arith.constant 0 : index
    %1 = vector.load %arg2[%c0_1, %c0_2] : memref<128x512xf32, #tpu.memory_space<vmem>>, vector<128x512xf32>
    %cst = arith.constant dense<0.000000e+00> : vector<8x512xf32>
    %2 = tpu.matmul %0, %1, %cst {dimension_numbers = #tpu.dot_dimension_numbers<[1], [0], [0], [1], [0, 0, 1, 1], [], []>} : vector<8x128xf32>, vector<128x512xf32>, vector<8x512xf32> -> vector<8x512xf32>
    %c0_3 = arith.constant 0 : index
    %c0_4 = arith.constant 0 : index
    %3 = vector.load %arg3[%c0_3, %c0_4] : memref<1x512xf32, #tpu.memory_space<vmem>>, vector<1x512xf32>
    %4 = vector.broadcast %3 : vector<1x512xf32> to vector<8x512xf32>
    %5 = arith.addf %2, %4 : vector<8x512xf32>
    %6 = arith.mulf %5, %5 : vector<8x512xf32>
    %cst_5 = arith.constant 5.000000e-01 : f32
    %7 = vector.broadcast %cst_5 : f32 to vector<8x512xf32>
    %8 = arith.mulf %7, %5 : vector<8x512xf32>
    %cst_6 = arith.constant 4.471500e-02 : f32
    %9 = vector.broadcast %cst_6 : f32 to vector<8x512xf32>
    %10 = arith.mulf %9, %6 : vector<8x512xf32>
    %11 = arith.mulf %10, %5 : vector<8x512xf32>
    %12 = arith.addf %5, %11 : vector<8x512xf32>
    %cst_7 = arith.constant 0.797884583 : f32
    %13 = vector.broadcast %cst_7 : f32 to vector<8x512xf32>
    %14 = arith.mulf %13, %12 : vector<8x512xf32>
    %15 = math.tanh %14 : vector<8x512xf32>
    %cst_8 = arith.constant 1.000000e+00 : f32
    %16 = vector.broadcast %cst_8 : f32 to vector<8x512xf32>
    %17 = arith.addf %16, %15 : vector<8x512xf32>
    %18 = arith.mulf %8, %17 : vector<8x512xf32>
    %c0_9 = arith.constant 0 : index
    %c0_10 = arith.constant 0 : index
    %19 = vector.load %arg4[%c0_9, %c0_10] : memref<512x128xf32, #tpu.memory_space<vmem>>, vector<512x128xf32>
    %cst_11 = arith.constant dense<0.000000e+00> : vector<8x128xf32>
    %20 = tpu.matmul %18, %19, %cst_11 {dimension_numbers = #tpu.dot_dimension_numbers<[1], [0], [0], [1], [0, 0, 1, 1], [], []>} : vector<8x512xf32>, vector<512x128xf32>, vector<8x128xf32> -> vector<8x128xf32>
    %c0_12 = arith.constant 0 : index
    %c0_13 = arith.constant 0 : index
    %21 = vector.load %arg5[%c0_12, %c0_13] : memref<1x128xf32, #tpu.memory_space<vmem>>, vector<1x128xf32>
    %22 = vector.broadcast %21 : vector<1x128xf32> to vector<8x128xf32>
    %23 = arith.addf %20, %22 : vector<8x128xf32>
    %c0_14 = arith.constant 0 : index
    %c0_15 = arith.constant 0 : index
    %24 = vector.load %arg6[%c0_14, %c0_15] : memref<8x128xf32, #tpu.memory_space<vmem>>, vector<8x128xf32>
    tpu.vector_store %arg6[%c0_14, %c0_15], %23 {strides = array<i32>} : memref<8x128xf32, #tpu.memory_space<vmem>>, vector<8x128xf32>,
    return
  }
  func.func @transform_0(%arg0: i32) -> (i32, i32) {
    %c0_i32 = arith.constant 0 : i32
    %c0_i32_0 = arith.constant 0 : i32
    return %arg0, %c0_i32 : i32, i32
  }
  func.func @transform_1(%arg0: i32) -> (i32, i32) {
    %c0_i32 = arith.constant 0 : i32
    %c0_i32_0 = arith.constant 0 : i32
    %c0_i32_1 = arith.constant 0 : i32
    return %c0_i32, %c0_i32_0 : i32, i32
  }
  func.func @transform_2(%arg0: i32) -> (i32, i32) {
    %c0_i32 = arith.constant 0 : i32
    %c0_i32_0 = arith.constant 0 : i32
    %c0_i32_1 = arith.constant 0 : i32
    return %c0_i32, %c0_i32_0 : i32, i32
  }
  func.func @transform_3(%arg0: i32) -> (i32, i32) {
    %c0_i32 = arith.constant 0 : i32
    %c0_i32_0 = arith.constant 0 : i32
    %c0_i32_1 = arith.constant 0 : i32
    return %c0_i32, %c0_i32_0 : i32, i32
  }
  func.func @transform_4(%arg0: i32) -> (i32, i32) {
    %c0_i32 = arith.constant 0 : i32
    %c0_i32_0 = arith.constant 0 : i32
    %c0_i32_1 = arith.constant 0 : i32
    return %c0_i32, %c0_i32_0 : i32, i32
  }
  func.func @transform_5(%arg0: i32) -> (i32, i32) {
    %c0_i32 = arith.constant 0 : i32
    %c0_i32_0 = arith.constant 0 : i32
    return %arg0, %c0_i32 : i32, i32
  }
}

</mosaic_0001>

<bundles_post_ra>
// kernel: tpu_custom_call.1
= control target key start
LH: loop header
LB: loop body
LE: loop exit
PB: predicated region body
PF: predicated region fallthrough
CT: control target
= control target key end

     0   :  { %10 = vsyncpa [#allocation3], 0  ;;  %s821_s0 = inlined_call_operand.hbm [shape: f32[8,128], index: 0, kind: input, shape index: {}]   ;;  %s822_s1 = inlined_call_operand.hbm [shape: f32[128,512], index: 1, kind: input, shape index: {}]   ;;  %s823_s2 = inlined_call_operand.hbm [shape: f32[1,512], index: 2, kind: input, shape index: {}]   ;;  %s824_s3 = inlined_call_operand.hbm [shape: f32[512,128], index: 3, kind: input, shape index: {}]   ;;  %s825_s4 = inlined_call_operand.vmem [shape: f32[1,128], index: 4, kind: input, shape index: {}]   ;;  %s826_s5 = inlined_call_operand.hbm [shape: f32[8,128], index: 5, kind: output, shape index: {}]  }
   0x1   :  { %11 = vsyncpa [#allocation6], 0 }
   0x2   :  { %12 = vsyncpa [#allocation9], 0 }
   0x3   :  { %13 = vsyncpa [#allocation4], 0  ;;  %s763_s18 = smov [#allocation5]  }
   0x4   :  { %s29_s19 = sshll.u32 %s763_s18, 4  ;;  %s30_s19 = int_to_ptr.vmem [resolvable:$true] %s29_s19 }
   0x5   :  { %s663_s20 = scalar_lea.vmem %s30_s19, 8192  ;;  %p668_p1 = scmp.lt.s32.totalorder %s30_s19, %s30_s19 }
   0x6   :  { %p664_p0 = scmp.ne.s32.totalorder %s30_s19, %s663_s20  ;;  %p669_p2 = scmp.lt.s32.totalorder %s663_s20, %s663_s20 }
   0x8   :  { %p670_p3 = por %p669_p2, %p668_p1 }
   0xa   :  { %p671_p4 = pnand %p670_p3, %p664_p0 }
   0xc   :  { %674 = shalt.err (!%p671_p4)
}
   0xd   :  { %s764_s21 = smov 512   ;;  %s765_s22 = smov 32  }
   0xe   :  { %35 = dma.hbm_to_vmem [thread:$0]  %s822_s1, 8192, %s30_s19, [#allocation6], %s764_s21, %s764_s21, %s765_s22  }
   0xf   :  { %s766_s25 = smov [#allocation2]   ;;  %s767_s27 = smov [#allocation7]  }
  0x10   :  { %s20_s26 = sshll.u32 %s766_s25, 4  ;;  %s42_s28 = sshll.u32 %s767_s27, 4  ;;  %s21_s26 = int_to_ptr.vmem [resolvable:$true] %s20_s26  ;;  %s43_s28 = int_to_ptr.vmem [resolvable:$true] %s42_s28 }
  0x11   :  { %s683_s29 = scalar_lea.vmem %s21_s26, 128  ;;  %p688_p6 = scmp.lt.s32.totalorder %s21_s26, %s21_s26 }
  0x12   :  { %p684_p5 = scmp.ne.s32.totalorder %s21_s26, %s683_s29  ;;  %p689_p7 = scmp.lt.s32.totalorder %s683_s29, %s683_s29 }
  0x14   :  { %p690_p8 = por %p689_p7, %p688_p6 }
  0x16   :  { %p691_p9 = pnand %p690_p8, %p684_p5 }
  0x18   :  { %694 = shalt.err (!%p691_p9)
}
  0x19   :  { %23 = dma.hbm_to_vmem [thread:$0]  %s821_s0, 128, %s21_s26, [#allocation3]  }
  0x1a   :  { %s703_s7 = scalar_lea.vmem %s43_s28, 64  ;;  %p708_p11 = scmp.lt.s32.totalorder %s43_s28, %s43_s28 }
  0x1b   :  { %p704_p10 = scmp.ne.s32.totalorder %s43_s28, %s703_s7  ;;  %p709_p12 = scmp.lt.s32.totalorder %s703_s7, %s703_s7 }
  0x1d   :  { %p710_p13 = por %p709_p12, %p708_p11 }
  0x1f   :  { %p711_p0 = pnand %p710_p13, %p704_p10 }
  0x21   :  { %714 = shalt.err (!%p711_p0)
}
  0x22   :  { %45 = dma.hbm_to_vmem [thread:$0]  %s823_s2, 64, %s43_s28, [#allocation6]  }
  0x23   :  { %s768_s9 = smov [#allocation8]  }
  0x24   :  { %s51_s10 = sshll.u32 %s768_s9, 4  ;;  %s52_s10 = int_to_ptr.vmem [resolvable:$true] %s51_s10 }
  0x25   :  { %s723_s11 = scalar_lea.vmem %s52_s10, 8192  ;;  %p728_p2 = scmp.lt.s32.totalorder %s52_s10, %s52_s10 }
  0x26   :  { %p724_p1 = scmp.ne.s32.totalorder %s52_s10, %s723_s11  ;;  %p729_p3 = scmp.lt.s32.totalorder %s723_s11, %s723_s11 }
  0x28   :  { %p730_p4 = por %p729_p3, %p728_p2 }
  0x2a   :  { %p731_p5 = pnand %p730_p4, %p724_p1 }
  0x2c   :  { %734 = shalt.err (!%p731_p5)
}
  0x2d   :  { %s769_s0 = smov 128   ;;  %s770_s12 = smov 8  }
  0x2e   :  { %57 = dma.hbm_to_vmem [thread:$0]  %s824_s3, 8192, %s52_s10, [#allocation9], %s769_s0, %s769_s0, %s770_s12  }
  0x2f   :  { %755 = dma.done.wait [#allocation3], 128  }
  0x30   :  { %756 = vsyncadd [#allocation3], 4294967168 }
  0x31   :  { %757 = dma.done.wait [#allocation6], 8256  }
  0x32   :  { %758 = vsyncadd [#allocation6], 4294959040 }
  0x33   :  { %759 = dma.done.wait [#allocation9], 8192  }
  0x34   :  { %760 = vsyncadd [#allocation9], 4294959104  ;;  %v771_v0 = vmov 0.0   ;;  %v134_v1 = vld [vmem:[#allocation5 + $0x1e8] sm:$0xff]  ;;  %v136_v2 = vld [vmem:[#allocation5 + $0x1f8] sm:$0xff]  ;;  %s772_s15 = smov [#allocation10]  }
  0x35   :  { %223 = vmatprep.mubr.f32.mxu0 %v771_v0  ;;  %294 = vmatprep.mubr.f32.mxu1 %v771_v0  ;;  %v133_v3 = vld [vmem:[#allocation5 + $0x1e0] sm:$0xff]  ;;  %v135_v4 = vld [vmem:[#allocation5 + $0x1f0] sm:$0xff]  ;;  %v130_v5 = vld [vmem:[#allocation5 + $0x1c8] sm:$0xff]  ;;  %s555_s16 = sshll.u32 %s772_s15, 4  ;;  %s556_s16 = int_to_ptr.vmem [resolvable:$true] %s555_s16 }
  0x36   :  { %159 = vmatprep.subr.mxu0 %v134_v1  ;;  %230 = vmatprep.subr.mxu1 %v136_v2  ;;  %v132_v6 = vld [vmem:[#allocation5 + $0x1d8] sm:$0xff]  ;;  %v129_v7 = vld [vmem:[#allocation5 + $0x1c0] sm:$0xff]  ;;  %v131_v8 = vld [vmem:[#allocation5 + $0x1d0] sm:$0xff]  ;;  %s735_s17 = scalar_lea.vmem %s556_s16, 128  ;;  %p740_p7 = scmp.lt.s32.totalorder %s556_s16, %s556_s16 }
  0x37   :  { %160 = vmatpush1.msra.mxu0 %v133_v3  ;;  %231 = vmatpush1.msra.mxu1 %v135_v4  ;;  %v126_v9 = vld [vmem:[#allocation5 + $0x1a8] sm:$0xff]  ;;  %v128_v10 = vld [vmem:[#allocation5 + $0x1b8] sm:$0xff]  ;;  %v125_v11 = vld [vmem:[#allocation5 + $0x1a0] sm:$0xff]  ;;  %p736_p6 = scmp.ne.s32.totalorder %s556_s16, %s735_s17  ;;  %p741_p8 = scmp.lt.s32.totalorder %s735_s17, %s735_s17 }
  0x38   :  { %161 = vmatprep.subr.mxu0 %v130_v5  ;;  %232 = vmatprep.subr.mxu1 %v132_v6  ;;  %v127_v12 = vld [vmem:[#allocation5 + $0x1b0] sm:$0xff]  ;;  %v122_v13 = vld [vmem:[#allocation5 + $0x188] sm:$0xff]  ;;  %v124_v14 = vld [vmem:[#allocation5 + $0x198] sm:$0xff] }
  0x39   :  { %162 = vmatpush1.msra.mxu0 %v129_v7  ;;  %233 = vmatpush1.msra.mxu1 %v131_v8  ;;  %v121_v15 = vld [vmem:[#allocation5 + $0x180] sm:$0xff]  ;;  %v123_v16 = vld [vmem:[#allocation5 + $0x190] sm:$0xff]  ;;  %v118_v17 = vld [vmem:[#allocation5 + $0x168] sm:$0xff]  ;;  %p742_p9 = por %p741_p8, %p740_p7 }
  0x3a   :  { %163 = vmatprep.subr.mxu0 %v126_v9  ;;  %234 = vmatprep.subr.mxu1 %v128_v10  ;;  %v120_v18 = vld [vmem:[#allocation5 + $0x178] sm:$0xff]  ;;  %v117_v19 = vld [vmem:[#allocation5 + $0x160] sm:$0xff]  ;;  %v119_v20 = vld [vmem:[#allocation5 + $0x170] sm:$0xff] }
  0x3b   :  { %164 = vmatpush1.msra.mxu0 %v125_v11  ;;  %235 = vmatpush1.msra.mxu1 %v127_v12  ;;  %v114_v21 = vld [vmem:[#allocation5 + $0x148] sm:$0xff]  ;;  %v116_v22 = vld [vmem:[#allocation5 + $0x158] sm:$0xff]  ;;  %v113_v23 = vld [vmem:[#allocation5 + $0x140] sm:$0xff]  ;;  %p743_p10 = pnand %p742_p9, %p736_p6 }
  0x3c   :  { %165 = vmatprep.subr.mxu0 %v122_v13  ;;  %236 = vmatprep.subr.mxu1 %v124_v14  ;;  %v115_v24 = vld [vmem:[#allocation5 + $0x150] sm:$0xff]  ;;  %v110_v25 = vld [vmem:[#allocation5 + $0x128] sm:$0xff]  ;;  %v112_v26 = vld [vmem:[#allocation5 + $0x138] sm:$0xff] }
  0x3d   :  { %166 = vmatpush1.msra.mxu0 %v121_v15  ;;  %237 = vmatpush1.msra.mxu1 %v123_v16  ;;  %v109_v27 = vld [vmem:[#allocation5 + $0x120] sm:$0xff]  ;;  %v111_v28 = vld [vmem:[#allocation5 + $0x130] sm:$0xff]  ;;  %v106_v29 = vld [vmem:[#allocation5 + $0x108] sm:$0xff] }
  0x3e   :  { %167 = vmatprep.subr.mxu0 %v118_v17  ;;  %238 = vmatprep.subr.mxu1 %v120_v18  ;;  %v108_v30 = vld [vmem:[#allocation5 + $0x118] sm:$0xff]  ;;  %v105_v31 = vld [vmem:[#allocation5 + $0x100] sm:$0xff]  ;;  %v107_v32 = vld [vmem:[#allocation5 + $0x110] sm:$0xff] }
  0x3f   :  { %168 = vmatpush1.msra.mxu0 %v117_v19  ;;  %239 = vmatpush1.msra.mxu1 %v119_v20  ;;  %v102_v33 = vld [vmem:[#allocation5 + $0xe8] sm:$0xff]  ;;  %v104_v34 = vld [vmem:[#allocation5 + $0xf8] sm:$0xff]  ;;  %v101_v35 = vld [vmem:[#allocation5 + $0xe0] sm:$0xff] }
  0x40   :  { %169 = vmatprep.subr.mxu0 %v114_v21  ;;  %240 = vmatprep.subr.mxu1 %v116_v22  ;;  %v103_v36 = vld [vmem:[#allocation5 + $0xf0] sm:$0xff]  ;;  %v98_v37 = vld [vmem:[#allocation5 + $0xc8] sm:$0xff]  ;;  %v100_v38 = vld [vmem:[#allocation5 + $0xd8] sm:$0xff] }
  0x41   :  { %170 = vmatpush1.msra.mxu0 %v113_v23  ;;  %241 = vmatpush1.msra.mxu1 %v115_v24  ;;  %v97_v39 = vld [vmem:[#allocation5 + $0xc0] sm:$0xff]  ;;  %v99_v40 = vld [vmem:[#allocation5 + $0xd0] sm:$0xff]  ;;  %v94_v41 = vld [vmem:[#allocation5 + $0xa8] sm:$0xff] }
  0x42   :  { %171 = vmatprep.subr.mxu0 %v110_v25  ;;  %242 = vmatprep.subr.mxu1 %v112_v26  ;;  %v96_v42 = vld [vmem:[#allocation5 + $0xb8] sm:$0xff]  ;;  %v93_v43 = vld [vmem:[#allocation5 + $0xa0] sm:$0xff]  ;;  %v95_v44 = vld [vmem:[#allocation5 + $0xb0] sm:$0xff] }
  0x43   :  { %172 = vmatpush1.msra.mxu0 %v109_v27  ;;  %243 = vmatpush1.msra.mxu1 %v111_v28  ;;  %v90_v45 = vld [vmem:[#allocation5 + $0x88] sm:$0xff]  ;;  %v92_v46 = vld [vmem:[#allocation5 + $0x98] sm:$0xff]  ;;  %v89_v47 = vld [vmem:[#allocation5 + $0x80] sm:$0xff] }
  0x44   :  { %173 = vmatprep.subr.mxu0 %v106_v29  ;;  %244 = vmatprep.subr.mxu1 %v108_v30  ;;  %v91_v48 = vld [vmem:[#allocation5 + $0x90] sm:$0xff]  ;;  %v86_v49 = vld [vmem:[#allocation5 + $0x68] sm:$0xff]  ;;  %v88_v50 = vld [vmem:[#allocation5 + $0x78] sm:$0xff] }
  0x45   :  { %174 = vmatpush1.msra.mxu0 %v105_v31  ;;  %245 = vmatpush1.msra.mxu1 %v107_v32  ;;  %v85_v51 = vld [vmem:[#allocation5 + $0x60] sm:$0xff]  ;;  %v87_v52 = vld [vmem:[#allocation5 + $0x70] sm:$0xff]  ;;  %v82_v53 = vld [vmem:[#allocation5 + $0x48] sm:$0xff] }
  0x46   :  { %175 = vmatprep.subr.mxu0 %v102_v33  ;;  %246 = vmatprep.subr.mxu1 %v104_v34  ;;  %v84_v54 = vld [vmem:[#allocation5 + $0x58] sm:$0xff]  ;;  %v81_v55 = vld [vmem:[#allocation5 + $0x40] sm:$0xff]  ;;  %v83_v56 = vld [vmem:[#allocation5 + $0x50] sm:$0xff] }
  0x47   :  { %176 = vmatpush1.msra.mxu0 %v101_v35  ;;  %247 = vmatpush1.msra.mxu1 %v103_v36  ;;  %v78_v57 = vld [vmem:[#allocation5 + $0x28] sm:$0xff]  ;;  %v80_v58 = vld [vmem:[#allocation5 + $0x38] sm:$0xff]  ;;  %v77_v59 = vld [vmem:[#allocation5 + $0x20] sm:$0xff] }
  0x48   :  { %177 = vmatprep.subr.mxu0 %v98_v37  ;;  %248 = vmatprep.subr.mxu1 %v100_v38  ;;  %v79_v60 = vld [vmem:[#allocation5 + $0x30] sm:$0xff]  ;;  %v74_v61 = vld [vmem:[#allocation5 + $0x8] sm:$0xff]  ;;  %v76_v62 = vld [vmem:[#allocation5 + $0x18] sm:$0xff] }
  0x49   :  { %178 = vmatpush1.msra.mxu0 %v97_v39  ;;  %249 = vmatpush1.msra.mxu1 %v99_v40  ;;  %v73_v63 = vld [vmem:[#allocation5] sm:$0xff]  ;;  %v75_v0 = vld [vmem:[#allocation5 + $0x10] sm:$0xff]  ;;  %v72_v1 = vld [vmem:[#allocation2] sm:$0xff] }
  0x4a   :  { %179 = vmatprep.subr.mxu0 %v94_v41  ;;  %250 = vmatprep.subr.mxu1 %v96_v42  ;;  %v368_v2 = vld [vmem:[#allocation8 + $0xf8] sm:$0xff]  ;;  %v367_v6 = vld [vmem:[#allocation8 + $0xf0] sm:$0xff]  ;;  %v366_v10 = vld [vmem:[#allocation8 + $0xe8] sm:$0xff] }
  0x4b   :  { %180 = vmatpush1.msra.mxu0 %v93_v43  ;;  %251 = vmatpush1.msra.mxu1 %v95_v44  ;;  %v400_v3 = vld [vmem:[#allocation8 + $0x1f8] sm:$0xff]  ;;  %v399_v7 = vld [vmem:[#allocation8 + $0x1f0] sm:$0xff]  ;;  %v398_v11 = vld [vmem:[#allocation8 + $0x1e8] sm:$0xff] }
  0x4c   :  { %181 = vmatprep.subr.mxu0 %v90_v45  ;;  %252 = vmatprep.subr.mxu1 %v92_v46  ;;  %v352_v4 = vld [vmem:[#allocation8 + $0x78] sm:$0xff]  ;;  %v351_v8 = vld [vmem:[#allocation8 + $0x70] sm:$0xff]  ;;  %v350_v12 = vld [vmem:[#allocation8 + $0x68] sm:$0xff] }
  0x4d   :  { %182 = vmatpush1.msra.mxu0 %v89_v47  ;;  %253 = vmatpush1.msra.mxu1 %v91_v48  ;;  %v384_v5 = vld [vmem:[#allocation8 + $0x178] sm:$0xff]  ;;  %v383_v9 = vld [vmem:[#allocation8 + $0x170] sm:$0xff]  ;;  %v382_v13 = vld [vmem:[#allocation8 + $0x168] sm:$0xff] }
  0x4e   :  { %183 = vmatprep.subr.mxu0 %v86_v49  ;;  %254 = vmatprep.subr.mxu1 %v88_v50  ;;  %v365_v14 = vld [vmem:[#allocation8 + $0xe0] sm:$0xff]  ;;  %v364_v18 = vld [vmem:[#allocation8 + $0xd8] sm:$0xff]  ;;  %v363_v22 = vld [vmem:[#allocation8 + $0xd0] sm:$0xff] }
  0x4f   :  { %184 = vmatpush1.msra.mxu0 %v85_v51  ;;  %255 = vmatpush1.msra.mxu1 %v87_v52  ;;  %v397_v15 = vld [vmem:[#allocation8 + $0x1e0] sm:$0xff]  ;;  %v396_v19 = vld [vmem:[#allocation8 + $0x1d8] sm:$0xff]  ;;  %v395_v23 = vld [vmem:[#allocation8 + $0x1d0] sm:$0xff] }
  0x50   :  { %185 = vmatprep.subr.mxu0 %v82_v53  ;;  %256 = vmatprep.subr.mxu1 %v84_v54  ;;  %v349_v16 = vld [vmem:[#allocation8 + $0x60] sm:$0xff]  ;;  %v348_v20 = vld [vmem:[#allocation8 + $0x58] sm:$0xff]  ;;  %v347_v24 = vld [vmem:[#allocation8 + $0x50] sm:$0xff] }
  0x51   :  { %186 = vmatpush1.msra.mxu0 %v81_v55  ;;  %257 = vmatpush1.msra.mxu1 %v83_v56  ;;  %v381_v17 = vld [vmem:[#allocation8 + $0x160] sm:$0xff]  ;;  %v380_v21 = vld [vmem:[#allocation8 + $0x158] sm:$0xff]  ;;  %v379_v25 = vld [vmem:[#allocation8 + $0x150] sm:$0xff] }
  0x52   :  { %187 = vmatprep.subr.mxu0 %v78_v57  ;;  %258 = vmatprep.subr.mxu1 %v80_v58  ;;  %v362_v26 = vld [vmem:[#allocation8 + $0xc8] sm:$0xff]  ;;  %v361_v30 = vld [vmem:[#allocation8 + $0xc0] sm:$0xff]  ;;  %v360_v34 = vld [vmem:[#allocation8 + $0xb8] sm:$0xff] }
  0x53   :  { %188 = vmatpush1.msra.mxu0 %v77_v59  ;;  %259 = vmatpush1.msra.mxu1 %v79_v60  ;;  %v394_v27 = vld [vmem:[#allocation8 + $0x1c8] sm:$0xff]  ;;  %v393_v31 = vld [vmem:[#allocation8 + $0x1c0] sm:$0xff]  ;;  %v392_v35 = vld [vmem:[#allocation8 + $0x1b8] sm:$0xff] }
  0x54   :  { %189 = vmatprep.subr.mxu0 %v74_v61  ;;  %260 = vmatprep.subr.mxu1 %v76_v62  ;;  %v346_v28 = vld [vmem:[#allocation8 + $0x48] sm:$0xff]  ;;  %v345_v32 = vld [vmem:[#allocation8 + $0x40] sm:$0xff]  ;;  %v344_v36 = vld [vmem:[#allocation8 + $0x38] sm:$0xff] }
  0x55   :  { %190 = vmatpush1.msra.mxu0 %v73_v63  ;;  %261 = vmatpush1.msra.mxu1 %v75_v0  ;;  %v378_v29 = vld [vmem:[#allocation8 + $0x148] sm:$0xff]  ;;  %v377_v33 = vld [vmem:[#allocation8 + $0x140] sm:$0xff]  ;;  %v376_v37 = vld [vmem:[#allocation8 + $0x138] sm:$0xff] }
  0x56   :  { %224 = vmatmul.mubr.f32.vlgmr.msra.gmra.mxu0 %v72_v1  ;;  %295 = vmatmul.mubr.f32.vlgmr.msra.gmra.mxu1 %v72_v1  ;;  %v359_v38 = vld [vmem:[#allocation8 + $0xb0] sm:$0xff]  ;;  %v358_v42 = vld [vmem:[#allocation8 + $0xa8] sm:$0xff]  ;;  %v357_v46 = vld [vmem:[#allocation8 + $0xa0] sm:$0xff] }
  0x57   :  { %567 = vmatprep.subr.mxu0 %v368_v2  ;;  %602 = vmatprep.subr.mxu1 %v400_v3  ;;  %v391_v39 = vld [vmem:[#allocation8 + $0x1b0] sm:$0xff]  ;;  %v390_v43 = vld [vmem:[#allocation8 + $0x1a8] sm:$0xff]  ;;  %v389_v47 = vld [vmem:[#allocation8 + $0x1a0] sm:$0xff]  ;;  %v139_v2 = vlaneseq }
  0x58   :  { %568 = vmatpush3.msra.mxu0 %v352_v4  ;;  %603 = vmatpush3.msra.mxu1 %v384_v5  ;;  %v343_v40 = vld [vmem:[#allocation8 + $0x30] sm:$0xff]  ;;  %v342_v44 = vld [vmem:[#allocation8 + $0x28] sm:$0xff]  ;;  %v341_v48 = vld [vmem:[#allocation8 + $0x20] sm:$0xff] }
  0x59   :  { %569 = vmatprep.subr.mxu0 %v367_v6  ;;  %604 = vmatprep.subr.mxu1 %v399_v7  ;;  %v375_v41 = vld [vmem:[#allocation8 + $0x130] sm:$0xff]  ;;  %v374_v45 = vld [vmem:[#allocation8 + $0x128] sm:$0xff]  ;;  %v373_v49 = vld [vmem:[#allocation8 + $0x120] sm:$0xff]  ;;  %v140_v3 = vshrl.u32 %v139_v2, 7 }
  0x5a   :  { %570 = vmatpush3.msra.mxu0 %v351_v8  ;;  %605 = vmatpush3.msra.mxu1 %v383_v9  ;;  %v356_v50 = vld [vmem:[#allocation8 + $0x98] sm:$0xff]  ;;  %v355_v54 = vld [vmem:[#allocation8 + $0x90] sm:$0xff]  ;;  %v354_v58 = vld [vmem:[#allocation8 + $0x88] sm:$0xff] }
  0x5b   :  { %571 = vmatprep.subr.mxu0 %v366_v10  ;;  %606 = vmatprep.subr.mxu1 %v398_v11  ;;  %v388_v51 = vld [vmem:[#allocation8 + $0x198] sm:$0xff]  ;;  %v387_v55 = vld [vmem:[#allocation8 + $0x190] sm:$0xff]  ;;  %v386_v59 = vld [vmem:[#allocation8 + $0x188] sm:$0xff]  ;;  %v141_v4 = vsub.s32 0, %v140_v3  ;;  %v149_v5 = vsub.s32 2, %v140_v3  ;;  %v145_v7 = vsub.s32 1, %v140_v3 }
  0x5c   :  { %572 = vmatpush3.msra.mxu0 %v350_v12  ;;  %607 = vmatpush3.msra.mxu1 %v382_v13  ;;  %v340_v52 = vld [vmem:[#allocation8 + $0x18] sm:$0xff]  ;;  %v339_v56 = vld [vmem:[#allocation8 + $0x10] sm:$0xff]  ;;  %v338_v60 = vld [vmem:[#allocation8 + $0x8] sm:$0xff]  ;;  %v153_v8 = vsub.s32 3, %v140_v3 }
  0x5d   :  { %573 = vmatprep.subr.mxu0 %v365_v14  ;;  %608 = vmatprep.subr.mxu1 %v397_v15  ;;  %v372_v53 = vld [vmem:[#allocation8 + $0x118] sm:$0xff]  ;;  %v371_v57 = vld [vmem:[#allocation8 + $0x110] sm:$0xff]  ;;  %v370_v61 = vld [vmem:[#allocation8 + $0x108] sm:$0xff] }
  0x5e   :  { %574 = vmatpush3.msra.mxu0 %v349_v16  ;;  %609 = vmatpush3.msra.mxu1 %v381_v17  ;;  %v353_v62 = vld [vmem:[#allocation8 + $0x80] sm:$0xff]  ;;  %v137_v6 = vld [vmem:[#allocation7] sm:$0xf] }
  0x5f   :  { %575 = vmatprep.subr.mxu0 %v364_v18  ;;  %610 = vmatprep.subr.mxu1 %v396_v19  ;;  %v385_v63 = vld [vmem:[#allocation8 + $0x180] sm:$0xff]  ;;  %v142_v9 = vrot.slane %v137_v6, %v141_v4  ;;  %v150_v10 = vrot.slane %v137_v6, %v149_v5  ;;  %v146_v13 = vrot.slane %v137_v6, %v145_v7 }
  0x60   :  { %576 = vmatpush3.msra.mxu0 %v348_v20  ;;  %611 = vmatpush3.msra.mxu1 %v380_v21  ;;  %v337_v0 = vld [vmem:[#allocation8] sm:$0xff]  ;;  %v154_v14 = vrot.slane %v137_v6, %v153_v8 }
  0x61   :  { %577 = vmatprep.subr.mxu0 %v363_v22  ;;  %612 = vmatprep.subr.mxu1 %v395_v23  ;;  %v369_v1 = vld [vmem:[#allocation8 + $0x100] sm:$0xff] }
  0x62   :  { %578 = vmatpush3.msra.mxu0 %v347_v24  ;;  %613 = vmatpush3.msra.mxu1 %v379_v25 }
  0x63   :  { %579 = vmatprep.subr.mxu0 %v362_v26  ;;  %614 = vmatprep.subr.mxu1 %v394_v27 }
  0x64   :  { %580 = vmatpush3.msra.mxu0 %v346_v28  ;;  %615 = vmatpush3.msra.mxu1 %v378_v29 }
  0x65   :  { %581 = vmatprep.subr.mxu0 %v361_v30  ;;  %616 = vmatprep.subr.mxu1 %v393_v31 }
  0x66   :  { %582 = vmatpush3.msra.mxu0 %v345_v32  ;;  %617 = vmatpush3.msra.mxu1 %v377_v33 }
  0x67   :  { %583 = vmatprep.subr.mxu0 %v360_v34  ;;  %618 = vmatprep.subr.mxu1 %v392_v35 }
  0x68   :  { %584 = vmatpush3.msra.mxu0 %v344_v36  ;;  %619 = vmatpush3.msra.mxu1 %v376_v37 }
  0x69   :  { %585 = vmatprep.subr.mxu0 %v359_v38  ;;  %620 = vmatprep.subr.mxu1 %v391_v39 }
  0x6a   :  { %586 = vmatpush3.msra.mxu0 %v343_v40  ;;  %621 = vmatpush3.msra.mxu1 %v375_v41 }
  0x6b   :  { %587 = vmatprep.subr.mxu0 %v358_v42  ;;  %622 = vmatprep.subr.mxu1 %v390_v43 }
  0x6c   :  { %588 = vmatpush3.msra.mxu0 %v342_v44  ;;  %623 = vmatpush3.msra.mxu1 %v374_v45 }
  0x6d   :  { %589 = vmatprep.subr.mxu0 %v357_v46  ;;  %624 = vmatprep.subr.mxu1 %v389_v47 }
  0x6e   :  { %590 = vmatpush3.msra.mxu0 %v341_v48  ;;  %625 = vmatpush3.msra.mxu1 %v373_v49 }
  0x6f   :  { %591 = vmatprep.subr.mxu0 %v356_v50  ;;  %626 = vmatprep.subr.mxu1 %v388_v51 }
  0x70   :  { %592 = vmatpush3.msra.mxu0 %v340_v52  ;;  %627 = vmatpush3.msra.mxu1 %v372_v53 }
  0x71   :  { %593 = vmatprep.subr.mxu0 %v355_v54  ;;  %628 = vmatprep.subr.mxu1 %v387_v55 }
  0x72   :  { %594 = vmatpush3.msra.mxu0 %v339_v56  ;;  %629 = vmatpush3.msra.mxu1 %v371_v57 }
  0x73   :  { %595 = vmatprep.subr.mxu0 %v354_v58  ;;  %630 = vmatprep.subr.mxu1 %v386_v59  ;;  %v566_v59 = vld [vmem:[%s825_s4] ss:$0 sm:$0xff] }
  0x74   :  { %596 = vmatpush3.msra.mxu0 %v338_v60  ;;  %631 = vmatpush3.msra.mxu1 %v370_v61 }
  0x75   :  { %597 = vmatprep.subr.mxu0 %v353_v62  ;;  %632 = vmatprep.subr.mxu1 %v385_v63 }
  0x76   :  { %598 = vmatpush3.msra.mxu0 %v337_v0  ;;  %633 = vmatpush3.msra.mxu1 %v369_v1 }
 0x116   :  { %v225_v11 = vpop.f32.mrf.mxu0  ;;  %v296_v12 = vpop.f32.mrf.mxu1 }
 0x117   :  { %v226_v15 = vadd.f32 %v225_v11, %v142_v9  ;;  %v297_v16 = vadd.f32 %v296_v12, %v150_v10 }
 0x118   :  { %v227_v17 = vpop.f32.mrf.mxu0  ;;  %v298_v18 = vpop.f32.mrf.mxu1 }
 0x119   :  { %v301_v19 = vmul.f32 %v226_v15, %v226_v15  ;;  %v303_v20 = vmul.f32 %v297_v16, %v297_v16  ;;  %v228_v21 = vadd.f32 %v227_v17, %v146_v13  ;;  %v299_v22 = vadd.f32 %v298_v18, %v154_v14 }
 0x11a   :  { %v305_v49 = vmul.f32 0.5, %v226_v15  ;;  %v307_v52 = vmul.f32 0.5, %v297_v16 }
 0x11b   :  { %v309_v23 = vmul.f32 0.044715, %v301_v19  ;;  %v311_v24 = vmul.f32 0.044715, %v303_v20  ;;  %v302_v25 = vmul.f32 %v228_v21, %v228_v21  ;;  %v304_v26 = vmul.f32 %v299_v22, %v299_v22 }
 0x11c   :  { %v306_v46 = vmul.f32 0.5, %v228_v21  ;;  %v308_v50 = vmul.f32 0.5, %v299_v22 }
 0x11d   :  { %v313_v27 = vmul.f32 %v309_v23, %v226_v15  ;;  %v315_v28 = vmul.f32 %v311_v24, %v297_v16  ;;  %v310_v29 = vmul.f32 0.044715, %v302_v25  ;;  %v312_v30 = vmul.f32 0.044715, %v304_v26 }
 0x11f   :  { %v317_v31 = vadd.f32 %v313_v27, %v226_v15  ;;  %v319_v32 = vadd.f32 %v315_v28, %v297_v16  ;;  %v314_v33 = vmul.f32 %v310_v29, %v228_v21  ;;  %v316_v34 = vmul.f32 %v312_v30, %v299_v22 }
 0x121   :  { %v321_v35 = vmul.f32 0.7978846, %v317_v31  ;;  %v323_v36 = vmul.f32 0.7978846, %v319_v32  ;;  %v318_v37 = vadd.f32 %v314_v33, %v228_v21  ;;  %v320_v38 = vadd.f32 %v316_v34, %v299_v22 }
 0x123   :  { %647 = vtanh.f32 %v321_v35  ;;  %v322_v39 = vmul.f32 0.7978846, %v318_v37  ;;  %v324_v40 = vmul.f32 0.7978846, %v320_v38 }
 0x124   :  { %649 = vtanh.f32 %v323_v36 }
 0x125   :  { %651 = vtanh.f32 %v322_v39 }
 0x126   :  { %653 = vtanh.f32 %v324_v40 }
 0x130   :  { %v648_v41 = vpop.eup %647 }
 0x131   :  { %v650_v42 = vpop.eup %649  ;;  %v329_v44 = vadd.f32 1.0, %v648_v41 }
 0x132   :  { %v652_v43 = vpop.eup %651  ;;  %v331_v48 = vadd.f32 1.0, %v650_v42 }
 0x133   :  { %v654_v45 = vpop.eup %653  ;;  %v330_v47 = vadd.f32 1.0, %v652_v43  ;;  %v333_v55 = vmul.f32 %v329_v44, %v305_v49 }
 0x134   :  { %v332_v51 = vadd.f32 1.0, %v654_v45  ;;  %v335_v56 = vmul.f32 %v331_v48, %v307_v52 }
 0x135   :  { %v334_v53 = vmul.f32 %v330_v47, %v306_v46 }
 0x136   :  { %v336_v54 = vmul.f32 %v332_v51, %v308_v50 }
 0x137   :  { %472 = vmatprep.mubr.f32.mxu0 %v334_v53 }
 0x138   :  { %542 = vmatprep.mubr.f32.mxu1 %v336_v54  ;;  %473 = vmatmul.mubr.f32.vlgmr.msra.gmra.mxu0 %v333_v55 }
 0x139   :  { %543 = vmatmul.mubr.f32.vlgmr.msra.gmra.mxu1 %v335_v56 }
 0x1f8   :  { %v599_v57 = vpop.f32.mrf.mxu0 }
 0x1f9   :  { %v634_v58 = vpop.f32.mrf.mxu1 }
 0x1fa   :  { %v600_v60 = vpop.f32.mrf.mxu0 }
 0x1fb   :  { %v601_v61 = vadd.f32 %v600_v60, %v599_v57  ;;  %v635_v62 = vpop.f32.mrf.mxu1 }
 0x1fc   :  { %v636_v0 = vadd.f32 %v635_v62, %v634_v58 }
 0x1fd   :  { %v475_v63 = vadd.f32 %v601_v61, %v566_v59 }
 0x1ff   :  { %v545_v1 = vadd.f32 %v636_v0, %v475_v63 }
 0x201   :  { %548 = vst [vmem:[#allocation10] sm:$0xff] %v545_v1 }
 0x202   :  { %746 = shalt.err (!%p743_p10)
}
 0x203   :  { %558 = dma.vmem_to_hbm [thread:$0]  %s556_s16, 128, %s826_s5, [#allocation4]  }
 0x204   :  { %761 = dma.done.wait [#allocation4], 128  }
 0x205   :  { %762 = vsyncadd [#allocation4], 4294967168 }
 0x206   :  { %562 = vsyncpa [#allocation3], 1 }
 0x207   :  { %563 = vsyncpa [#allocation6], 1 }
 0x208   :  { %564 = vsyncpa [#allocation9], 1 }
 0x209   :  { %565 = vsyncpa [#allocation4], 1 }

</bundles_post_ra>
